<compile_context>
chip_gen: v6e
topology: v6e:2x2x1
jax: 0.10.0
libtpu: 0.0.40
codegen_flags: <defaults>
</compile_context>

<pallas_src>
import functools

import jax
import jax.numpy as jnp
from jax.experimental import pallas as pl
from jax.experimental.pallas import tpu as pltpu

_LANE = 128


def _round_up(x, m):
    return ((x + m - 1) // m) * m


def _attention_kernel(x_ref, d_ref, w1t_ref, v_ref, o_ref, *, bb, sp, s_valid):
    # x_ref   : (bb*sp, Hp)  static rows for this batch tile (row = (b, s), lane = hidden)
    # d_ref   : (bb, 1, Hp)  per-batch decoder projection  W2 @ dec_b
    # w1t_ref : (Hp, Hp)     W1^T (shared across the grid, fetched once)
    # v_ref   : (1, 1, Hp)   v
    # o_ref   : (bb, sp)     attention probabilities (padded sequence on lanes)
    x = x_ref[...]
    w1t = w1t_ref[...]

    # One big lane-dense MXU matmul: M = bb*sp, K = N = Hp.
    t = jnp.dot(x, w1t, preferred_element_type=jnp.float32)       # (bb*sp, Hp)
    t3 = t.reshape(bb, sp, t.shape[-1])                           # aligned split (sp % 8 == 0)

    u = jnp.tanh(t3 + d_ref[...])                                 # bias broadcast over seq
    scores = jnp.sum(u * v_ref[...], axis=-1)                     # (bb, sp)

    # Mask padded sequence lanes before the softmax.
    lane = jax.lax.broadcasted_iota(jnp.int32, (bb, sp), 1)
    scores = jnp.where(lane < s_valid, scores, jnp.float32(-1e30))

    # Softmax over the (lane-resident) sequence axis.
    m = jnp.max(scores, axis=-1, keepdims=True)
    e = jnp.exp(scores - m)
    denom = jnp.sum(e, axis=-1, keepdims=True)
    r = pl.reciprocal(denom, approx=True)
    r = r * (2.0 - denom * r)        # one Newton step -> f32 accuracy, still no VALU divide
    o_ref[...] = (e * r).astype(o_ref.dtype)


def attention_forward(static_hidden, decoder_hidden, v_param, w_param):
    """static_hidden: (B,H,S), decoder_hidden: (B,H), v_param: (1,1,H),
       w_param: (1,H,2H).  Returns attns: (B,1,S)."""
    B, H, S = static_hidden.shape
    out_dtype = static_hidden.dtype

    Hp = _round_up(H, _LANE)
    Sp = _round_up(S, _LANE)

    w = w_param.reshape(H, 2 * H).astype(jnp.float32)
    w1 = w[:, :H]                     # multiplies static_hidden
    w2 = w[:, H:]                     # multiplies the broadcast decoder_hidden
    v = v_param.reshape(H).astype(jnp.float32)

    # Hoisted decoder projection: one (B,H)x(H,H) GEMM instead of B degenerate
    # N=1 GEMVs inside the kernel (per the performance review).
    dproj = jnp.dot(decoder_hidden.astype(jnp.float32), w2.T,
                    precision=jax.lax.Precision.HIGHEST)           # (B, H)

    # Batch tile: ~4 MiB of static rows per grid step, multiple of 8 rows.
    row_bytes = Sp * Hp * 4
    cap = max(8, ((4 * 1024 * 1024) // row_bytes) // 8 * 8)
    if B <= cap:
        bb, b_pad = B, B              # single grid step, block == full array
    else:
        bb = cap
        b_pad = _round_up(B, bb)

    x_p = jnp.pad(static_hidden.astype(jnp.float32),
                  ((0, b_pad - B), (0, Hp - H), (0, Sp - S)))
    # Lane-dense slab: rows = (batch, seq), lanes = hidden.
    x2 = x_p.transpose(0, 2, 1).reshape(b_pad * Sp, Hp)

    d3 = jnp.pad(dproj, ((0, b_pad - B), (0, Hp - H))).reshape(b_pad, 1, Hp)
    w1t = jnp.pad(w1.T, ((0, Hp - H), (0, Hp - H)))                # (Hp, Hp)
    v3 = jnp.pad(v, (0, Hp - H)).reshape(1, 1, Hp)

    kernel = functools.partial(_attention_kernel, bb=bb, sp=Sp, s_valid=S)

    out = pl.pallas_call(
        kernel,
        out_shape=jax.ShapeDtypeStruct((b_pad, Sp), jnp.float32),
        grid_spec=pltpu.PrefetchScalarGridSpec(
            num_scalar_prefetch=0,
            grid=(b_pad // bb,),
            in_specs=[
                pl.BlockSpec((bb * Sp, Hp), lambda i: (i, 0)),     # static rows
                pl.BlockSpec((bb, 1, Hp), lambda i: (i, 0, 0)),    # decoder projection
                pl.BlockSpec((Hp, Hp), lambda i: (0, 0)),          # W1^T (resident)
                pl.BlockSpec((1, 1, Hp), lambda i: (0, 0, 0)),     # v   (resident)
            ],
            out_specs=pl.BlockSpec((bb, Sp), lambda i: (i, 0)),
        ),
        compiler_params=pltpu.CompilerParams(
            dimension_semantics=("parallel",),
            vmem_limit_bytes=32 * 1024 * 1024,
        ),
    )(x2, d3, w1t, v3)

    return out[:B, :S][:, None, :].astype(out_dtype)


def attention_reference(static_hidden, decoder_hidden, v_param, w_param):
    """Pure-JAX reference mirroring the PyTorch forward exactly."""
    B, H, S = static_hidden.shape
    hidden = jnp.broadcast_to(decoder_hidden[:, :, None], (B, H, S))
    hidden = jnp.concatenate([static_hidden, hidden], axis=1)          # (B, 2H, S)
    W = jnp.broadcast_to(w_param, (B, H, 2 * H))
    v = jnp.broadcast_to(v_param, (B, 1, H))
    hp = jax.lax.Precision.HIGHEST
    attns = jnp.einsum("bij,bjs->bis", v,
                       jnp.tanh(jnp.einsum("bij,bjs->bis", W, hidden, precision=hp)),
                       precision=hp)
    return jax.nn.softmax(attns, axis=2)


if __name__ == "__main__":
    B, H, S = 2, 32, 8
    key = jax.random.PRNGKey(0)
    k1, k2, k3, k4 = jax.random.split(key, 4)

    static_hidden = jax.random.normal(k1, (B, H, S), dtype=jnp.float32)
    decoder_hidden = jax.random.normal(k2, (B, H), dtype=jnp.float32)

    # Module __init__ uses zeros; use small random values so the matmul /
    # tanh / softmax path is actually exercised.
    v_param = 0.1 * jax.random.normal(k3, (1, 1, H), dtype=jnp.float32)
    w_param = 0.1 * jax.random.normal(k4, (1, H, 2 * H), dtype=jnp.float32)

    out = attention_forward(static_hidden, decoder_hidden, v_param, w_param)
    out = jax.block_until_ready(out)

    ref = attention_reference(static_hidden, decoder_hidden, v_param, w_param)
    assert out.shape == (B, 1, S)
    assert jnp.allclose(out, ref, atol=1e-3, rtol=1e-3), "mismatch vs reference"
    assert jnp.allclose(jnp.sum(out, axis=-1), 1.0, atol=1e-3)

    print("KERNEL_OK")
</pallas_src>

<mosaic_0001>
module attributes {stable_mosaic.version = 11 : i64} {
  func.func @_attention_kernel(%arg0: i32, %arg1: memref<256x128xf32, #tpu.memory_space<vmem>>, %arg2: memref<2x1x128xf32, #tpu.memory_space<vmem>>, %arg3: memref<128x128xf32, #tpu.memory_space<vmem>>, %arg4: memref<1x1x128xf32, #tpu.memory_space<vmem>>, %arg5: memref<2x128xf32, #tpu.memory_space<vmem>>) attributes {dimension_semantics = [#tpu.dimension_semantics<parallel>], iteration_bounds = array<i64: 1>, scalar_prefetch = 0 : i64, scratch_operands = 0 : i64, tpu.core_type = #tpu.core_type<tc>, window_params = [{transform_indices = @transform_0, window_bounds = array<i64: 256, 128>}, {transform_indices = @transform_1, window_bounds = array<i64: 2, 1, 128>}, {pipeline_mode = #tpu.pipeline_mode<synchronous>, transform_indices = @transform_2, window_bounds = array<i64: 128, 128>}, {pipeline_mode = #tpu.pipeline_mode<synchronous>, transform_indices = @transform_3, window_bounds = array<i64: 1, 1, 128>}, {transform_indices = @transform_4, window_bounds = array<i64: 2, 128>}]} {
    %c0 = arith.constant 0 : index
    %c0_0 = arith.constant 0 : index
    %0 = vector.load %arg1[%c0, %c0_0] : memref<256x128xf32, #tpu.memory_space<vmem>>, vector<256x128xf32>
    %c0_1 = arith.constant 0 : index
    %c0_2 = arith.constant 0 : index
    %1 = vector.load %arg3[%c0_1, %c0_2] : memref<128x128xf32, #tpu.memory_space<vmem>>, vector<128x128xf32>
    %cst = arith.constant dense<0.000000e+00> : vector<256x128xf32>
    %2 = tpu.matmul %0, %1, %cst {dimension_numbers = #tpu.dot_dimension_numbers<[1], [0], [0], [1], [0, 0, 1, 1], [], []>} : vector<256x128xf32>, vector<128x128xf32>, vector<256x128xf32> -> vector<256x128xf32>
    %3 = vector.shape_cast %2 : vector<256x128xf32> to vector<2x128x128xf32>
    %c0_3 = arith.constant 0 : index
    %c0_4 = arith.constant 0 : index
    %c0_5 = arith.constant 0 : index
    %4 = vector.load %arg2[%c0_3, %c0_4, %c0_5] : memref<2x1x128xf32, #tpu.memory_space<vmem>>, vector<2x1x128xf32>
    %5 = vector.broadcast %4 : vector<2x1x128xf32> to vector<2x128x128xf32>
    %6 = arith.addf %3, %5 : vector<2x128x128xf32>
    %7 = math.tanh %6 : vector<2x128x128xf32>
    %c0_6 = arith.constant 0 : index
    %c0_7 = arith.constant 0 : index
    %c0_8 = arith.constant 0 : index
    %8 = vector.load %arg4[%c0_6, %c0_7, %c0_8] : memref<1x1x128xf32, #tpu.memory_space<vmem>>, vector<1x1x128xf32>
    %9 = vector.broadcast %8 : vector<1x1x128xf32> to vector<2x128x128xf32>
    %10 = arith.mulf %7, %9 : vector<2x128x128xf32>
    %cst_9 = arith.constant dense<0.000000e+00> : vector<2x128xf32>
    %11 = vector.multi_reduction <add>, %10, %cst_9 [2] : vector<2x128x128xf32> to vector<2x128xf32>
    %12 = tpu.iota {dimensions = array<i32: 1>} : vector<2x128xi32>
    %c8_i32 = arith.constant 8 : i32
    %13 = vector.broadcast %c8_i32 : i32 to vector<2x128xi32>
    %14 = arith.cmpi slt, %12, %13 : vector<2x128xi32>
    %cst_10 = arith.constant -1.000000e+30 : f32
    %15 = vector.broadcast %cst_10 : f32 to vector<2x128xf32>
    %16 = arith.select %14, %11, %15 : vector<2x128xi1>, vector<2x128xf32>
    %cst_11 = arith.constant dense<0xFF800000> : vector<2xf32>
    %17 = vector.multi_reduction <maximumf>, %16, %cst_11 [1] : vector<2x128xf32> to vector<2xf32>
    %18 = vector.shape_cast %17 : vector<2xf32> to vector<2x1xf32>
    %19 = vector.broadcast %18 : vector<2x1xf32> to vector<2x128xf32>
    %20 = arith.subf %16, %19 : vector<2x128xf32>
    %21 = math.exp %20 : vector<2x128xf32>
    %cst_12 = arith.constant dense<0.000000e+00> : vector<2xf32>
    %22 = vector.multi_reduction <add>, %21, %cst_12 [1] : vector<2x128xf32> to vector<2xf32>
    %23 = vector.shape_cast %22 : vector<2xf32> to vector<2x1xf32>
    %24 = tpu.reciprocal %23 {approx = true} : vector<2x1xf32> -> vector<2x1xf32>
    %25 = arith.mulf %23, %24 : vector<2x1xf32>
    %cst_13 = arith.constant 2.000000e+00 : f32
    %26 = vector.broadcast %cst_13 : f32 to vector<2x1xf32>
    %27 = arith.subf %26, %25 : vector<2x1xf32>
    %28 = arith.mulf %24, %27 : vector<2x1xf32>
    %29 = vector.broadcast %28 : vector<2x1xf32> to vector<2x128xf32>
    %30 = arith.mulf %21, %29 : vector<2x128xf32>
    %c0_14 = arith.constant 0 : index
    %c0_15 = arith.constant 0 : index
    %31 = vector.load %arg5[%c0_14, %c0_15] : memref<2x128xf32, #tpu.memory_space<vmem>>, vector<2x128xf32>
    tpu.vector_store %arg5[%c0_14, %c0_15], %30 {strides = array<i32>} : memref<2x128xf32, #tpu.memory_space<vmem>>, vector<2x128xf32>,
    return
  }
  func.func @transform_0(%arg0: i32) -> (i32, i32) {
    %c0_i32 = arith.constant 0 : i32
    %c0_i32_0 = arith.constant 0 : i32
    return %arg0, %c0_i32 : i32, i32
  }
  func.func @transform_1(%arg0: i32) -> (i32, i32, i32) {
    %c0_i32 = arith.constant 0 : i32
    %c0_i32_0 = arith.constant 0 : i32
    %c0_i32_1 = arith.constant 0 : i32
    return %arg0, %c0_i32, %c0_i32_0 : i32, i32, i32
  }
  func.func @transform_2(%arg0: i32) -> (i32, i32) {
    %c0_i32 = arith.constant 0 : i32
    %c0_i32_0 = arith.constant 0 : i32
    %c0_i32_1 = arith.constant 0 : i32
    return %c0_i32, %c0_i32_0 : i32, i32
  }
  func.func @transform_3(%arg0: i32) -> (i32, i32, i32) {
    %c0_i32 = arith.constant 0 : i32
    %c0_i32_0 = arith.constant 0 : i32
    %c0_i32_1 = arith.constant 0 : i32
    %c0_i32_2 = arith.constant 0 : i32
    return %c0_i32, %c0_i32_0, %c0_i32_1 : i32, i32, i32
  }
  func.func @transform_4(%arg0: i32) -> (i32, i32) {
    %c0_i32 = arith.constant 0 : i32
    %c0_i32_0 = arith.constant 0 : i32
    return %arg0, %c0_i32 : i32, i32
  }
}

</mosaic_0001>

<bundles_post_ra>
// kernel: tpu_custom_call.1
= control target key start
LH: loop header
LB: loop body
LE: loop exit
PB: predicated region body
PF: predicated region fallthrough
CT: control target
= control target key end

     0   :  { %9 = vsyncpa [#allocation3], 0  ;;  %s1294_s0 = inlined_call_operand.hbm [shape: f32[256,128], index: 0, kind: input, shape index: {}]   ;;  %s1295_s1 = inlined_call_operand.hbm [shape: f32[2,1,128], index: 1, kind: input, shape index: {}]   ;;  %s1296_s2 = inlined_call_operand.hbm [shape: f32[128,128], index: 2, kind: input, shape index: {}]   ;;  %s1297_s3 = inlined_call_operand.vmem [shape: f32[1,1,128], index: 3, kind: input, shape index: {}]   ;;  %s1298_s4 = inlined_call_operand.hbm [shape: f32[2,128], index: 4, kind: output, shape index: {}]  }
   0x1   :  { %10 = vsyncpa [#allocation6], 0 }
   0x2   :  { %11 = vsyncpa [#allocation4], 0  ;;  %s1097_s15 = smov [#allocation5]  }
   0x3   :  { %s29_s16 = sshll.u32 %s1097_s15, 4  ;;  %s30_s16 = int_to_ptr.vmem [resolvable:$true] %s29_s16 }
   0x4   :  { %s1019_s17 = scalar_lea.vmem %s30_s16, 32  ;;  %p1024_p1 = scmp.lt.s32.totalorder %s30_s16, %s30_s16 }
   0x5   :  { %p1020_p0 = scmp.ne.s32.totalorder %s30_s16, %s1019_s17  ;;  %p1025_p2 = scmp.lt.s32.totalorder %s1019_s17, %s1019_s17 }
   0x7   :  { %p1026_p3 = por %p1025_p2, %p1024_p1 }
   0x9   :  { %p1027_p4 = pnand %p1026_p3, %p1020_p0 }
   0xb   :  { %1030 = shalt.err (!%p1027_p4)
}
   0xc   :  { %s1098_s18 = smov 16   ;;  %s1099_s19 = smov 1  }
   0xd   :  { %35 = dma.hbm_to_vmem [thread:$0]  %s1295_s1, 32, %s30_s16, [#allocation6], %s1098_s18, %s1098_s18, %s1099_s19  }
   0xe   :  { %s1100_s22 = smov [#allocation2]  }
   0xf   :  { %s17_s23 = sshll.u32 %s1100_s22, 4  ;;  %s18_s23 = int_to_ptr.vmem [resolvable:$true] %s17_s23 }
  0x10   :  { %s1039_s24 = scalar_lea.vmem %s18_s23, 4096  ;;  %p1044_p6 = scmp.lt.s32.totalorder %s18_s23, %s18_s23 }
  0x11   :  { %p1040_p5 = scmp.ne.s32.totalorder %s18_s23, %s1039_s24  ;;  %p1045_p7 = scmp.lt.s32.totalorder %s1039_s24, %s1039_s24 }
  0x13   :  { %p1046_p8 = por %p1045_p7, %p1044_p6 }
  0x15   :  { %p1047_p9 = pnand %p1046_p8, %p1040_p5 }
  0x17   :  { %1050 = shalt.err (!%p1047_p9)
}
  0x18   :  { %s1101_s25 = smov 128   ;;  %s1102_s26 = smov 8  }
  0x19   :  { %23 = dma.hbm_to_vmem [thread:$0]  %s1294_s0, 4096, %s18_s23, [#allocation3], %s1101_s25, %s1101_s25, %s1102_s26  }
  0x1a   :  { %s1103_s29 = smov [#allocation7]  }
  0x1b   :  { %s41_s30 = sshll.u32 %s1103_s29, 4  ;;  %s42_s30 = int_to_ptr.vmem [resolvable:$true] %s41_s30 }
  0x1c   :  { %s1059_s1 = scalar_lea.vmem %s42_s30, 2048  ;;  %p1064_p11 = scmp.lt.s32.totalorder %s42_s30, %s42_s30 }
  0x1d   :  { %p1060_p10 = scmp.ne.s32.totalorder %s42_s30, %s1059_s1  ;;  %p1065_p12 = scmp.lt.s32.totalorder %s1059_s1, %s1059_s1 }
  0x1f   :  { %p1066_p13 = por %p1065_p12, %p1064_p11 }
  0x21   :  { %p1067_p0 = pnand %p1066_p13, %p1060_p10 }
  0x23   :  { %1070 = shalt.err (!%p1067_p0)
}
  0x24   :  { %47 = dma.hbm_to_vmem [thread:$0]  %s1296_s2, 2048, %s42_s30, [#allocation6], %s1101_s25, %s1101_s25, %s1102_s26  }
  0x25   :  { %1091 = dma.done.wait [#allocation3], 4096  }
  0x26   :  { %1092 = vsyncadd [#allocation3], 4294963200 }
  0x27   :  { %1093 = dma.done.wait [#allocation6], 2080  }
  0x28   :  { %1094 = vsyncadd [#allocation6], 4294965216  ;;  %v106_v0 = vld [vmem:[#allocation7 + $0x78] sm:$0xff]  ;;  %v105_v1 = vld [vmem:[#allocation7 + $0x70] sm:$0xff]  ;;  %vm557_vm0 = vcmask 130112   ;;  %vm564_vm1 = vcmask 195712  }
  0x29   :  { %823 = vmatprep.subr.mxu0 %v106_v0  ;;  %903 = vmatprep.subr.mxu1 %v106_v0  ;;  %v104_v2 = vld [vmem:[#allocation7 + $0x68] sm:$0xff]  ;;  %v103_v3 = vld [vmem:[#allocation7 + $0x60] sm:$0xff]  ;;  %v102_v4 = vld [vmem:[#allocation7 + $0x58] sm:$0xff]  ;;  %vm571_vm2 = vcmask 261312   ;;  %vm578_vm3 = vcmask 326912   ;;  %vm585_vm4 = vcmask 392512  }
  0x2a   :  { %824 = vmatpush3.msra.mxu0 %v106_v0  ;;  %919 = vmatpush3.msra.mxu1 %v106_v0  ;;  %v101_v5 = vld [vmem:[#allocation7 + $0x50] sm:$0xff]  ;;  %v100_v6 = vld [vmem:[#allocation7 + $0x48] sm:$0xff]  ;;  %v99_v7 = vld [vmem:[#allocation7 + $0x40] sm:$0xff]  ;;  %vm592_vm5 = vcmask 458112   ;;  %vm599_vm6 = vcmask 523712   ;;  %vm606_vm7 = vcmask 589312  }
  0x2b   :  { %825 = vmatprep.subr.mxu0 %v105_v1  ;;  %904 = vmatprep.subr.mxu1 %v105_v1  ;;  %v98_v8 = vld [vmem:[#allocation7 + $0x38] sm:$0xff]  ;;  %v97_v9 = vld [vmem:[#allocation7 + $0x30] sm:$0xff]  ;;  %v96_v10 = vld [vmem:[#allocation7 + $0x28] sm:$0xff]  ;;  %vm613_vm8 = vcmask 654912   ;;  %vm620_vm9 = vcmask 720512   ;;  %vm627_vm10 = vcmask 786112  }
  0x2c   :  { %826 = vmatpush3.msra.mxu0 %v105_v1  ;;  %920 = vmatpush3.msra.mxu1 %v105_v1  ;;  %v95_v11 = vld [vmem:[#allocation7 + $0x20] sm:$0xff]  ;;  %v94_v12 = vld [vmem:[#allocation7 + $0x18] sm:$0xff]  ;;  %v93_v13 = vld [vmem:[#allocation7 + $0x10] sm:$0xff]  ;;  %vm634_vm11 = vcmask 851712   ;;  %vm641_vm12 = vcmask 917312   ;;  %vm648_vm13 = vcmask 982912  }
  0x2d   :  { %827 = vmatprep.subr.mxu0 %v104_v2  ;;  %905 = vmatprep.subr.mxu1 %v104_v2  ;;  %v92_v14 = vld [vmem:[#allocation7 + $0x8] sm:$0xff]  ;;  %v91_v15 = vld [vmem:[#allocation7] sm:$0xff]  ;;  %v62_v22 = vld [vmem:[#allocation2 + $0x18] sm:$0xff]  ;;  %vm655_vm14 = vcmask 1048512   ;;  %vm736_vm15 = vcmask 1041409  }
  0x2e   :  { %828 = vmatpush3.msra.mxu0 %v104_v2  ;;  %921 = vmatpush3.msra.mxu1 %v104_v2  ;;  %v59_v16 = vld [vmem:[#allocation2] sm:$0xff]  ;;  %v60_v18 = vld [vmem:[#allocation2 + $0x8] sm:$0xff]  ;;  %v61_v20 = vld [vmem:[#allocation2 + $0x10] sm:$0xff] }
  0x2f   :  { %829 = vmatprep.subr.mxu0 %v103_v3  ;;  %906 = vmatprep.subr.mxu1 %v103_v3  ;;  %v75_v17 = vld [vmem:[#allocation2 + $0x80] sm:$0xff]  ;;  %v76_v19 = vld [vmem:[#allocation2 + $0x88] sm:$0xff]  ;;  %v77_v21 = vld [vmem:[#allocation2 + $0x90] sm:$0xff] }
  0x30   :  { %830 = vmatpush3.msra.mxu0 %v103_v3  ;;  %922 = vmatpush3.msra.mxu1 %v103_v3  ;;  %v78_v23 = vld [vmem:[#allocation2 + $0x98] sm:$0xff]  ;;  %v63_v24 = vld [vmem:[#allocation2 + $0x20] sm:$0xff]  ;;  %v64_v26 = vld [vmem:[#allocation2 + $0x28] sm:$0xff] }
  0x31   :  { %831 = vmatprep.subr.mxu0 %v102_v4  ;;  %907 = vmatprep.subr.mxu1 %v102_v4  ;;  %v79_v25 = vld [vmem:[#allocation2 + $0xa0] sm:$0xff]  ;;  %v80_v27 = vld [vmem:[#allocation2 + $0xa8] sm:$0xff]  ;;  %v65_v28 = vld [vmem:[#allocation2 + $0x30] sm:$0xff] }
  0x32   :  { %832 = vmatpush3.msra.mxu0 %v102_v4  ;;  %923 = vmatpush3.msra.mxu1 %v102_v4  ;;  %v81_v29 = vld [vmem:[#allocation2 + $0xb0] sm:$0xff]  ;;  %v66_v30 = vld [vmem:[#allocation2 + $0x38] sm:$0xff]  ;;  %v67_v32 = vld [vmem:[#allocation2 + $0x40] sm:$0xff] }
  0x33   :  { %833 = vmatprep.subr.mxu0 %v101_v5  ;;  %908 = vmatprep.subr.mxu1 %v101_v5  ;;  %v82_v31 = vld [vmem:[#allocation2 + $0xb8] sm:$0xff]  ;;  %v83_v33 = vld [vmem:[#allocation2 + $0xc0] sm:$0xff]  ;;  %v68_v34 = vld [vmem:[#allocation2 + $0x48] sm:$0xff] }
  0x34   :  { %834 = vmatpush3.msra.mxu0 %v101_v5  ;;  %924 = vmatpush3.msra.mxu1 %v101_v5  ;;  %v84_v35 = vld [vmem:[#allocation2 + $0xc8] sm:$0xff]  ;;  %v69_v36 = vld [vmem:[#allocation2 + $0x50] sm:$0xff]  ;;  %v70_v38 = vld [vmem:[#allocation2 + $0x58] sm:$0xff] }
  0x35   :  { %835 = vmatprep.subr.mxu0 %v100_v6  ;;  %909 = vmatprep.subr.mxu1 %v100_v6  ;;  %v85_v37 = vld [vmem:[#allocation2 + $0xd0] sm:$0xff]  ;;  %v86_v39 = vld [vmem:[#allocation2 + $0xd8] sm:$0xff]  ;;  %v71_v40 = vld [vmem:[#allocation2 + $0x60] sm:$0xff] }
  0x36   :  { %836 = vmatpush3.msra.mxu0 %v100_v6  ;;  %925 = vmatpush3.msra.mxu1 %v100_v6  ;;  %v87_v41 = vld [vmem:[#allocation2 + $0xe0] sm:$0xff]  ;;  %v72_v42 = vld [vmem:[#allocation2 + $0x68] sm:$0xff]  ;;  %v73_v44 = vld [vmem:[#allocation2 + $0x70] sm:$0xff] }
  0x37   :  { %837 = vmatprep.subr.mxu0 %v99_v7  ;;  %910 = vmatprep.subr.mxu1 %v99_v7  ;;  %v88_v43 = vld [vmem:[#allocation2 + $0xe8] sm:$0xff]  ;;  %v89_v45 = vld [vmem:[#allocation2 + $0xf0] sm:$0xff]  ;;  %v74_v46 = vld [vmem:[#allocation2 + $0x78] sm:$0xff] }
  0x38   :  { %838 = vmatpush3.msra.mxu0 %v99_v7  ;;  %926 = vmatpush3.msra.mxu1 %v99_v7  ;;  %v90_v47 = vld [vmem:[#allocation2 + $0xf8] sm:$0xff]  ;;  %v1139_v48 = vld [vmem:[#allocation5] ss:$0 sm:$0xff]  ;;  %v1141_v49 = vld [vmem:[#allocation5 + $0x1] ss:$0 sm:$0xff] }
  0x39   :  { %839 = vmatprep.subr.mxu0 %v98_v8  ;;  %911 = vmatprep.subr.mxu1 %v98_v8  ;;  %v1156_v7 = vld [vmem:[%s1297_s3] ss:$0 sm:$0xff]  ;;  %s1104_s3 = smov [#allocation8]  }
  0x3a   :  { %840 = vmatpush3.msra.mxu0 %v98_v8  ;;  %927 = vmatpush3.msra.mxu1 %v98_v8  ;;  %s762_s7 = sshll.u32 %s1104_s3, 4  ;;  %s763_s7 = int_to_ptr.vmem [resolvable:$true] %s762_s7 }
  0x3b   :  { %841 = vmatprep.subr.mxu0 %v97_v9  ;;  %912 = vmatprep.subr.mxu1 %v97_v9  ;;  %s1071_s8 = scalar_lea.vmem %s763_s7, 32  ;;  %p1076_p2 = scmp.lt.s32.totalorder %s763_s7, %s763_s7 }
  0x3c   :  { %842 = vmatpush3.msra.mxu0 %v97_v9  ;;  %928 = vmatpush3.msra.mxu1 %v97_v9  ;;  %p1072_p1 = scmp.ne.s32.totalorder %s763_s7, %s1071_s8  ;;  %p1077_p3 = scmp.lt.s32.totalorder %s1071_s8, %s1071_s8 }
  0x3d   :  { %843 = vmatprep.subr.mxu0 %v96_v10  ;;  %913 = vmatprep.subr.mxu1 %v96_v10 }
  0x3e   :  { %844 = vmatpush3.msra.mxu0 %v96_v10  ;;  %929 = vmatpush3.msra.mxu1 %v96_v10  ;;  %p1078_p4 = por %p1077_p3, %p1076_p2 }
  0x3f   :  { %845 = vmatprep.subr.mxu0 %v95_v11  ;;  %914 = vmatprep.subr.mxu1 %v95_v11 }
  0x40   :  { %846 = vmatpush3.msra.mxu0 %v95_v11  ;;  %930 = vmatpush3.msra.mxu1 %v95_v11  ;;  %p1079_p5 = pnand %p1078_p4, %p1072_p1 }
  0x41   :  { %847 = vmatprep.subr.mxu0 %v94_v12  ;;  %915 = vmatprep.subr.mxu1 %v94_v12 }
  0x42   :  { %848 = vmatpush3.msra.mxu0 %v94_v12  ;;  %931 = vmatpush3.msra.mxu1 %v94_v12 }
  0x43   :  { %849 = vmatprep.subr.mxu0 %v93_v13  ;;  %916 = vmatprep.subr.mxu1 %v93_v13 }
  0x44   :  { %850 = vmatpush3.msra.mxu0 %v93_v13  ;;  %932 = vmatpush3.msra.mxu1 %v93_v13 }
  0x45   :  { %851 = vmatprep.subr.mxu0 %v92_v14  ;;  %917 = vmatprep.subr.mxu1 %v92_v14 }
  0x46   :  { %852 = vmatpush3.msra.mxu0 %v92_v14  ;;  %933 = vmatpush3.msra.mxu1 %v92_v14 }
  0x47   :  { %853 = vmatprep.subr.mxu0 %v91_v15  ;;  %918 = vmatprep.subr.mxu1 %v91_v15 }
  0x48   :  { %854 = vmatpush3.msra.mxu0 %v91_v15  ;;  %934 = vmatpush3.msra.mxu1 %v91_v15 }
  0x49   :  { %855 = vmatprep.mubr.f32.mxu0 %v59_v16  ;;  %879 = vmatprep.mubr.f32.mxu1 %v75_v17 }
  0x4a   :  { %856 = vmatmul.mubr.f32.vlgmr.msra.gmra.mxu0 %v60_v18  ;;  %880 = vmatmul.mubr.f32.vlgmr.msra.gmra.mxu1 %v76_v19 }
  0x4b   :  { %858 = vmatprep.mubr.f32.mxu0 %v61_v20  ;;  %882 = vmatprep.mubr.f32.mxu1 %v77_v21 }
  0x4e   :  { %859 = vmatmul.mubr.f32.gmra.mxu0 %v62_v22  ;;  %883 = vmatmul.mubr.f32.gmra.mxu1 %v78_v23 }
  0x4f   :  { %861 = vmatprep.mubr.f32.mxu0 %v63_v24  ;;  %885 = vmatprep.mubr.f32.mxu1 %v79_v25 }
  0x52   :  { %862 = vmatmul.mubr.f32.gmra.mxu0 %v64_v26  ;;  %886 = vmatmul.mubr.f32.gmra.mxu1 %v80_v27 }
  0x53   :  { %864 = vmatprep.mubr.f32.mxu0 %v65_v28  ;;  %888 = vmatprep.mubr.f32.mxu1 %v81_v29 }
  0x56   :  { %865 = vmatmul.mubr.f32.gmra.mxu0 %v66_v30  ;;  %889 = vmatmul.mubr.f32.gmra.mxu1 %v82_v31 }
  0x57   :  { %867 = vmatprep.mubr.f32.mxu0 %v67_v32  ;;  %891 = vmatprep.mubr.f32.mxu1 %v83_v33 }
  0x5a   :  { %868 = vmatmul.mubr.f32.gmra.mxu0 %v68_v34  ;;  %892 = vmatmul.mubr.f32.gmra.mxu1 %v84_v35 }
  0x5b   :  { %870 = vmatprep.mubr.f32.mxu0 %v69_v36  ;;  %894 = vmatprep.mubr.f32.mxu1 %v85_v37 }
  0x5e   :  { %871 = vmatmul.mubr.f32.gmra.mxu0 %v70_v38  ;;  %895 = vmatmul.mubr.f32.gmra.mxu1 %v86_v39 }
  0x5f   :  { %873 = vmatprep.mubr.f32.mxu0 %v71_v40  ;;  %897 = vmatprep.mubr.f32.mxu1 %v87_v41 }
  0x62   :  { %874 = vmatmul.mubr.f32.gmra.mxu0 %v72_v42  ;;  %898 = vmatmul.mubr.f32.gmra.mxu1 %v88_v43 }
  0x63   :  { %876 = vmatprep.mubr.f32.mxu0 %v73_v44  ;;  %900 = vmatprep.mubr.f32.mxu1 %v89_v45 }
  0x66   :  { %877 = vmatmul.mubr.f32.gmra.mxu0 %v74_v46  ;;  %901 = vmatmul.mubr.f32.gmra.mxu1 %v90_v47 }
 0x10a   :  { %v857_v50 = vpop.f32.mrf.mxu0  ;;  %v881_v51 = vpop.f32.mrf.mxu1 }
 0x10b   :  { %v347_v52 = vadd.f32 %v857_v50, %v1139_v48  ;;  %v363_v53 = vadd.f32 %v881_v51, %v1141_v49 }
 0x10c   :  { %v173_v54 = vpop.f32.mrf.mxu0  ;;  %v253_v55 = vpop.f32.mrf.mxu1 }
 0x10d   :  { %943 = vtanh.f32 %v347_v52  ;;  %v346_v56 = vadd.f32 %v1139_v48, %v173_v54  ;;  %v362_v57 = vadd.f32 %v1141_v49, %v253_v55 }
 0x10e   :  { %945 = vtanh.f32 %v363_v53  ;;  %v860_v58 = vpop.f32.mrf.mxu0  ;;  %v884_v59 = vpop.f32.mrf.mxu1 }
 0x10f   :  { %947 = vtanh.f32 %v346_v56  ;;  %v349_v60 = vadd.f32 %v860_v58, %v1139_v48  ;;  %v365_v61 = vadd.f32 %v884_v59, %v1141_v49 }
 0x110   :  { %949 = vtanh.f32 %v362_v57  ;;  %v183_v62 = vpop.f32.mrf.mxu0  ;;  %v263_v63 = vpop.f32.mrf.mxu1 }
 0x111   :  { %951 = vtanh.f32 %v349_v60  ;;  %v348_v0 = vadd.f32 %v1139_v48, %v183_v62  ;;  %v364_v1 = vadd.f32 %v1141_v49, %v263_v63 }
 0x112   :  { %953 = vtanh.f32 %v365_v61  ;;  %v863_v2 = vpop.f32.mrf.mxu0  ;;  %v887_v4 = vpop.f32.mrf.mxu1 }
 0x113   :  { %v351_v3 = vadd.f32 %v863_v2, %v1139_v48  ;;  %v367_v5 = vadd.f32 %v887_v4, %v1141_v49  ;;  %955 = vtanh.f32 %v348_v0 }
 0x114   :  { %957 = vtanh.f32 %v364_v1  ;;  %v193_v6 = vpop.f32.mrf.mxu0  ;;  %v273_v8 = vpop.f32.mrf.mxu1 }
 0x115   :  { %959 = vtanh.f32 %v351_v3  ;;  %v350_v11 = vadd.f32 %v1139_v48, %v193_v6  ;;  %v366_v14 = vadd.f32 %v1141_v49, %v273_v8 }
 0x116   :  { %961 = vtanh.f32 %v367_v5  ;;  %v866_v16 = vpop.f32.mrf.mxu0  ;;  %v890_v19 = vpop.f32.mrf.mxu1 }
 0x117   :  { %v353_v18 = vadd.f32 %v866_v16, %v1139_v48  ;;  %v369_v21 = vadd.f32 %v890_v19, %v1141_v49  ;;  %963 = vtanh.f32 %v350_v11 }
 0x118   :  { %965 = vtanh.f32 %v366_v14  ;;  %v203_v25 = vpop.f32.mrf.mxu0  ;;  %v283_v26 = vpop.f32.mrf.mxu1 }
 0x119   :  { %967 = vtanh.f32 %v353_v18  ;;  %v352_v29 = vadd.f32 %v1139_v48, %v203_v25  ;;  %v368_v31 = vadd.f32 %v1141_v49, %v283_v26 }
 0x11a   :  { %v944_v9 = vpop.eup %943  ;;  %969 = vtanh.f32 %v369_v21  ;;  %v869_v32 = vpop.f32.mrf.mxu0 }
 0x11b   :  { %v946_v10 = vpop.eup %945  ;;  %v418_v12 = vmul.f32 %v944_v9, %v1156_v7  ;;  %v355_v34 = vadd.f32 %v869_v32, %v1139_v48  ;;  %v893_v35 = vpop.f32.mrf.mxu1  ;;  %971 = vtanh.f32 %v352_v29 }
 0x11c   :  { %v948_v13 = vpop.eup %947  ;;  %v434_v15 = vmul.f32 %v946_v10, %v1156_v7  ;;  %v371_v37 = vadd.f32 %v893_v35, %v1141_v49  ;;  %973 = vtanh.f32 %v368_v31  ;;  %v213_v41 = vpop.f32.mrf.mxu0 }
 0x11d   :  { %v950_v17 = vpop.eup %949  ;;  %451 = vadd.xlane.f32.xlu0 %v418_v12  ;;  %v417_v23 = vmul.f32 %v948_v13, %v1156_v7  ;;  %975 = vtanh.f32 %v355_v34  ;;  %v293_v42 = vpop.f32.mrf.mxu1  ;;  %v354_v45 = vadd.f32 %v1139_v48, %v213_v41 }
 0x11e   :  { %v952_v20 = vpop.eup %951  ;;  %483 = vadd.xlane.f32.xlu1 %v434_v15  ;;  %v433_v24 = vmul.f32 %v950_v17, %v1156_v7  ;;  %977 = vtanh.f32 %v371_v37  ;;  %v370_v47 = vadd.f32 %v1141_v49, %v293_v42  ;;  %v872_v50 = vpop.f32.mrf.mxu0 }
 0x11f   :  { %v954_v22 = vpop.eup %953  ;;  %v420_v27 = vmul.f32 %v952_v20, %v1156_v7  ;;  %v357_v52 = vadd.f32 %v872_v50, %v1139_v48  ;;  %v896_v53 = vpop.f32.mrf.mxu1  ;;  %979 = vtanh.f32 %v354_v45 }
 0x120   :  { %v436_v28 = vmul.f32 %v954_v22, %v1156_v7  ;;  %v956_v30 = vpop.eup %955  ;;  %v373_v55 = vadd.f32 %v896_v53, %v1141_v49  ;;  %981 = vtanh.f32 %v370_v47  ;;  %v223_v59 = vpop.f32.mrf.mxu0 }
 0x121   :  { %449 = vadd.xlane.f32.xlu0 %v417_v23  ;;  %v958_v33 = vpop.eup %957  ;;  %v419_v39 = vmul.f32 %v956_v30, %v1156_v7  ;;  %983 = vtanh.f32 %v357_v52  ;;  %v303_v60 = vpop.f32.mrf.mxu1  ;;  %v356_v0 = vadd.f32 %v1139_v48, %v223_v59 }
 0x122   :  { %481 = vadd.xlane.f32.xlu1 %v433_v24  ;;  %v960_v36 = vpop.eup %959  ;;  %v435_v40 = vmul.f32 %v958_v33, %v1156_v7  ;;  %985 = vtanh.f32 %v373_v55  ;;  %v875_v63 = vpop.f32.mrf.mxu0  ;;  %v372_v3 = vadd.f32 %v1141_v49, %v303_v60 }
 0x123   :  { %v962_v38 = vpop.eup %961  ;;  %v422_v43 = vmul.f32 %v960_v36, %v1156_v7  ;;  %v899_v1 = vpop.f32.mrf.mxu1  ;;  %v359_v5 = vadd.f32 %v875_v63, %v1139_v48  ;;  %987 = vtanh.f32 %v356_v0  ;;  %v513_v0 = vlaneseq }
 0x124   :  { %v438_v44 = vmul.f32 %v962_v38, %v1156_v7  ;;  %v964_v46 = vpop.eup %963  ;;  %v375_v8 = vadd.f32 %v899_v1, %v1141_v49  ;;  %v233_v9 = vpop.f32.mrf.mxu0  ;;  %989 = vtanh.f32 %v372_v3 }
 0x125   :  { %455 = vadd.xlane.f32.xlu0 %v420_v27  ;;  %v966_v51 = vpop.eup %965  ;;  %v421_v57 = vmul.f32 %v964_v46, %v1156_v7  ;;  %v313_v12 = vpop.f32.mrf.mxu1  ;;  %991 = vtanh.f32 %v359_v5  ;;  %v358_v18 = vadd.f32 %v1139_v48, %v233_v9  ;;  %v1216_v3 = vand.u32 127, %v513_v0 }
 0x126   :  { %487 = vadd.xlane.f32.xlu1 %v436_v28  ;;  %v968_v54 = vpop.eup %967  ;;  %v437_v58 = vmul.f32 %v966_v51, %v1156_v7  ;;  %v878_v14 = vpop.f32.mrf.mxu0  ;;  %993 = vtanh.f32 %v375_v8  ;;  %v374_v20 = vadd.f32 %v1141_v49, %v313_v12 }
 0x127   :  { %v970_v56 = vpop.eup %969  ;;  %v424_v61 = vmul.f32 %v968_v54, %v1156_v7  ;;  %v902_v16 = vpop.f32.mrf.mxu1  ;;  %995 = vtanh.f32 %v358_v18  ;;  %v361_v32 = vadd.f32 %v878_v14, %v1139_v48  ;;  %v559_v5 = vadd.s32 4294967280, %v1216_v3 }
 0x128   :  { %v440_v62 = vmul.f32 %v970_v56, %v1156_v7  ;;  %v972_v2 = vpop.eup %971  ;;  %v243_v21 = vpop.f32.mrf.mxu0  ;;  %997 = vtanh.f32 %v374_v20  ;;  %v377_v34 = vadd.f32 %v902_v16, %v1141_v49  ;;  %v552_v8 = vadd.s32 4294967288, %v1216_v3 }
 0x129   :  { %453 = vadd.xlane.f32.xlu0 %v419_v39  ;;  %v974_v4 = vpop.eup %973  ;;  %v423_v11 = vmul.f32 %v972_v2, %v1156_v7  ;;  %v323_v23 = vpop.f32.mrf.mxu1  ;;  %v360_v26 = vadd.f32 %v1139_v48, %v243_v21  ;;  %v580_v18 = vadd.s32 4294967256, %v1216_v3 }
 0x12a   :  { %485 = vadd.xlane.f32.xlu1 %v435_v40  ;;  %v976_v6 = vpop.eup %975  ;;  %v439_v13 = vmul.f32 %v974_v4, %v1156_v7  ;;  %v376_v28 = vadd.f32 %v1141_v49, %v323_v23  ;;  %v587_v23 = vadd.s32 4294967248, %v1216_v3 }
 0x12b   :  { %v978_v10 = vpop.eup %977  ;;  %v426_v15 = vmul.f32 %v976_v6, %v1156_v7  ;;  %999 = vtanh.f32 %v360_v26  ;;  %v1223_v6 = vshrl.u32 %v513_v0, 7 }
 0x12c   :  { %v442_v17 = vmul.f32 %v978_v10, %v1156_v7  ;;  %v980_v19 = vpop.eup %979  ;;  %1001 = vtanh.f32 %v376_v28  ;;  %v594_v28 = vadd.s32 4294967240, %v1216_v3 }
 0x12d   :  { %459 = vadd.xlane.f32.xlu0 %v422_v43  ;;  %v982_v22 = vpop.eup %981  ;;  %v425_v27 = vmul.f32 %v980_v19, %v1156_v7  ;;  %1003 = vtanh.f32 %v361_v32  ;;  %v550_v10 = vsub.s32 %v1216_v3, %v1223_v6  ;;  %v562_v12 = vsub.s32 %v559_v5, %v1223_v6 }
 0x12e   :  { %491 = vadd.xlane.f32.xlu1 %v438_v44  ;;  %v984_v24 = vpop.eup %983  ;;  %v441_v29 = vmul.f32 %v982_v22, %v1156_v7  ;;  %1005 = vtanh.f32 %v377_v34  ;;  %v555_v14 = vsub.s32 %v552_v8, %v1223_v6  ;;  %v601_v32 = vadd.s32 4294967232, %v1216_v3 }
 0x12f   :  { %v986_v25 = vpop.eup %985  ;;  %v428_v30 = vmul.f32 %v984_v24, %v1156_v7 }
 0x130   :  { %v444_v31 = vmul.f32 %v986_v25, %v1156_v7  ;;  %v988_v33 = vpop.eup %987 }
 0x131   :  { %457 = vadd.xlane.f32.xlu0 %v421_v57  ;;  %v990_v35 = vpop.eup %989  ;;  %v427_v38 = vmul.f32 %v988_v33, %v1156_v7 }
 0x132   :  { %489 = vadd.xlane.f32.xlu1 %v437_v58  ;;  %v992_v36 = vpop.eup %991  ;;  %v443_v39 = vmul.f32 %v990_v35, %v1156_v7 }
 0x133   :  { %v994_v37 = vpop.eup %993  ;;  %v430_v40 = vmul.f32 %v992_v36, %v1156_v7 }
 0x134   :  { %v446_v48 = vmul.f32 %v994_v37, %v1156_v7  ;;  %v996_v41 = vpop.eup %995  ;;  %v590_v37 = vsub.s32 %v587_v23, %v1223_v6 }
 0x135   :  { %463 = vadd.xlane.f32.xlu0 %v424_v61  ;;  %v998_v49 = vpop.eup %997  ;;  %v429_v42 = vmul.f32 %v996_v41, %v1156_v7  ;;  %v597_v41 = vsub.s32 %v594_v28, %v1223_v6  ;;  %v650_v28 = vadd.s32 4294967176, %v1216_v3 }
 0x136   :  { %495 = vadd.xlane.f32.xlu1 %v440_v62  ;;  %v445_v44 = vmul.f32 %v998_v49, %v1156_v7 }
 0x138   :  { %v1000_v43 = vpop.eup %999 }
 0x139   :  { %461 = vadd.xlane.f32.xlu0 %v423_v11  ;;  %v1002_v45 = vpop.eup %1001  ;;  %v431_v46 = vmul.f32 %v1000_v43, %v1156_v7  ;;  %v608_v43 = vadd.s32 4294967224, %v1216_v3 }
 0x13a   :  { %493 = vadd.xlane.f32.xlu1 %v439_v13  ;;  %v1004_v47 = vpop.eup %1003  ;;  %v447_v50 = vmul.f32 %v1002_v45, %v1156_v7  ;;  %v573_v13 = vadd.s32 4294967264, %v1216_v3 }
 0x13b   :  { %v1006_v51 = vpop.eup %1005  ;;  %v432_v52 = vmul.f32 %v1004_v47, %v1156_v7 }
 0x13c   :  { %v448_v53 = vmul.f32 %v1006_v51, %v1156_v7  ;;  %v576_v22 = vsub.s32 %v573_v13, %v1223_v6  ;;  %v615_v51 = vadd.s32 4294967216, %v1216_v3  ;;  %v636_v13 = vadd.s32 4294967192, %v1216_v3 }
 0x13d   :  { %467 = vadd.xlane.f32.xlu0 %v426_v15  ;;  %v566_v15 = vadd.s32 4294967272, %v1216_v3 }
 0x13e   :  { %499 = vadd.xlane.f32.xlu1 %v442_v17 }
 0x13f   :  { %v569_v25 = vsub.s32 %v566_v15, %v1223_v6 }
 0x141   :  { %465 = vadd.xlane.f32.xlu0 %v425_v27 }
 0x142   :  { %497 = vadd.xlane.f32.xlu1 %v441_v29 }
 0x145   :  { %471 = vadd.xlane.f32.xlu0 %v428_v30 }
 0x146   :  { %503 = vadd.xlane.f32.xlu1 %v444_v31  ;;  %v583_v31 = vsub.s32 %v580_v18, %v1223_v6 }
 0x149   :  { %469 = vadd.xlane.f32.xlu0 %v427_v38 }
 0x14a   :  { %501 = vadd.xlane.f32.xlu1 %v443_v39 }
 0x14d   :  { %475 = vadd.xlane.f32.xlu0 %v430_v40 }
 0x14e   :  { %507 = vadd.xlane.f32.xlu1 %v446_v48 }
 0x151   :  { %473 = vadd.xlane.f32.xlu0 %v429_v42 }
 0x152   :  { %505 = vadd.xlane.f32.xlu1 %v445_v44  ;;  %v604_v44 = vsub.s32 %v601_v32, %v1223_v6 }
 0x155   :  { %477 = vadd.xlane.f32.xlu0 %v431_v46 }
 0x156   :  { %509 = vadd.xlane.f32.xlu1 %v447_v50 }
 0x159   :  { %479 = vadd.xlane.f32.xlu0 %v432_v52 }
 0x15a   :  { %511 = vadd.xlane.f32.xlu1 %v448_v53 }
 0x1a6   :  { %v452_v54 = vpop.xlane.xlu0 %451 }
 0x1a7   :  { %v484_v55 = vpop.xlane.xlu1 %483  ;;  %v556_v24 = vrot.slane %v452_v54, %v555_v14 }
 0x1a8   :  { %v664_v27 = vrot.slane %v484_v55, %v555_v14 }
 0x1aa   :  { %v450_v56 = vpop.xlane.xlu0 %449 }
 0x1ab   :  { %v482_v57 = vpop.xlane.xlu1 %481  ;;  %v551_v17 = vrot.slane %v450_v56, %v550_v10  ;;  %v622_v56 = vadd.s32 4294967208, %v1216_v3 }
 0x1ac   :  { %v660_v20 = vrot.slane %v482_v57, %v550_v10 }
 0x1ad   :  { %v558_v30 = vsel %vm557_vm0, %v556_v24, %v551_v17  ;;  %v625_v10 = vsub.s32 %v622_v56, %v1223_v6 }
 0x1ae   :  { %v456_v58 = vpop.xlane.xlu0 %455  ;;  %v665_v34 = vsel %vm557_vm0, %v664_v27, %v660_v20  ;;  %v643_v20 = vadd.s32 4294967184, %v1216_v3  ;;  %vm515_vm0 = vcmp.lt.s32.totalorder %v1216_v3, 8 }
 0x1af   :  { %v488_v59 = vpop.xlane.xlu1 %487  ;;  %v570_v38 = vrot.slane %v456_v58, %v569_v25 }
 0x1b0   :  { %v674_v48 = vrot.slane %v488_v59, %v569_v25  ;;  %v611_v59 = vsub.s32 %v608_v43, %v1223_v6 }
 0x1b2   :  { %v454_v60 = vpop.xlane.xlu0 %453 }
 0x1b3   :  { %v486_v61 = vpop.xlane.xlu1 %485  ;;  %v563_v21 = vrot.slane %v454_v60, %v562_v12 }
 0x1b4   :  { %v669_v26 = vrot.slane %v486_v61, %v562_v12  ;;  %v629_v61 = vadd.s32 4294967200, %v1216_v3 }
 0x1b5   :  { %v565_v35 = vsel %vm564_vm1, %v563_v21, %v558_v30 }
 0x1b6   :  { %v1212_v62 = vpop.xlane.xlu0 %459  ;;  %v670_v39 = vsel %vm564_vm1, %v669_v26, %v665_v34  ;;  %v572_v42 = vsel %vm571_vm2, %v570_v38, %v565_v35  ;;  %v632_v15 = vsub.s32 %v629_v61, %v1223_v6  ;;  %v639_v26 = vsub.s32 %v636_v13, %v1223_v6 }
 0x1b7   :  { %v1214_v63 = vpop.xlane.xlu1 %491  ;;  %v675_v46 = vsel %vm571_vm2, %v674_v48, %v670_v39  ;;  %v584_v52 = vrot.slane %v1212_v62, %v583_v31  ;;  %v653_v38 = vsub.s32 %v650_v28, %v1223_v6  ;;  %vm740_vm1 = vcmask 1041408  }
 0x1b8   :  { %v684_v55 = vrot.slane %v1214_v63, %v583_v31 }
 0x1ba   :  { %v458_v1 = vpop.xlane.xlu0 %457 }
 0x1bb   :  { %v490_v2 = vpop.xlane.xlu1 %489  ;;  %v577_v36 = vrot.slane %v458_v1, %v576_v22 }
 0x1bc   :  { %v679_v40 = vrot.slane %v490_v2, %v576_v22  ;;  %v618_v2 = vsub.s32 %v615_v51, %v1223_v6 }
 0x1bd   :  { %v579_v47 = vsel %vm578_vm3, %v577_v36, %v572_v42 }
 0x1be   :  { %v1218_v7 = vpop.xlane.xlu0 %463  ;;  %v680_v53 = vsel %vm578_vm3, %v679_v40, %v675_v46  ;;  %v586_v58 = vsel %vm585_vm4, %v584_v52, %v579_v47 }
 0x1bf   :  { %v1220_v4 = vpop.xlane.xlu1 %495  ;;  %v685_v0 = vsel %vm585_vm4, %v684_v55, %v680_v53  ;;  %v598_v5 = vrot.slane %v1218_v7, %v597_v41 }
 0x1c2   :  { %v1226_v9 = vpop.xlane.xlu0 %461 }
 0x1c3   :  { %v1230_v11 = vpop.xlane.xlu1 %493  ;;  %v591_v50 = vrot.slane %v1226_v9, %v590_v37  ;;  %v694_v9 = vrot.slane %v1220_v4, %v597_v41 }
 0x1c4   :  { %v689_v54 = vrot.slane %v1230_v11, %v590_v37 }
 0x1c5   :  { %v593_v62 = vsel %vm592_vm5, %v591_v50, %v586_v58 }
 0x1c6   :  { %v1236_v16 = vpop.xlane.xlu0 %467  ;;  %v690_v63 = vsel %vm592_vm5, %v689_v54, %v685_v0  ;;  %v600_v12 = vsel %vm599_vm6, %v598_v5, %v593_v62 }
 0x1c7   :  { %v1239_v19 = vpop.xlane.xlu1 %499  ;;  %v695_v17 = vsel %vm599_vm6, %v694_v9, %v690_v63  ;;  %v612_v21 = vrot.slane %v1236_v16, %v611_v59  ;;  %v646_v16 = vsub.s32 %v643_v20, %v1223_v6 }
 0x1c8   :  { %v704_v23 = vrot.slane %v1239_v19, %v611_v59 }
 0x1ca   :  { %v466_v29 = vpop.xlane.xlu0 %465 }
 0x1cb   :  { %v498_v33 = vpop.xlane.xlu1 %497  ;;  %v605_v1 = vrot.slane %v466_v29, %v604_v44 }
 0x1cc   :  { %v699_v8 = vrot.slane %v498_v33, %v604_v44 }
 0x1cd   :  { %v607_v18 = vsel %vm606_vm7, %v605_v1, %v600_v12 }
 0x1ce   :  { %v1251_v49 = vpop.xlane.xlu0 %471  ;;  %v700_v4 = vsel %vm606_vm7, %v699_v8, %v695_v17  ;;  %v614_v25 = vsel %vm613_vm8, %v612_v21, %v607_v18 }
 0x1cf   :  { %v1256_v45 = vpop.xlane.xlu1 %503  ;;  %v705_v29 = vsel %vm613_vm8, %v704_v23, %v700_v4  ;;  %v626_v32 = vrot.slane %v1251_v49, %v625_v10 }
 0x1d0   :  { %v714_v34 = vrot.slane %v1256_v45, %v625_v10 }
 0x1d2   :  { %v470_v57 = vpop.xlane.xlu0 %469 }
 0x1d3   :  { %v502_v60 = vpop.xlane.xlu1 %501  ;;  %v619_v7 = vrot.slane %v470_v57, %v618_v2 }
 0x1d4   :  { %v709_v22 = vrot.slane %v502_v60, %v618_v2 }
 0x1d5   :  { %v621_v30 = vsel %vm620_vm9, %v619_v7, %v614_v25 }
 0x1d6   :  { %v476_v11 = vpop.xlane.xlu0 %475  ;;  %v710_v33 = vsel %vm620_vm9, %v709_v22, %v705_v29  ;;  %v628_v36 = vsel %vm627_vm10, %v626_v32, %v621_v30 }
 0x1d7   :  { %v508_v14 = vpop.xlane.xlu1 %507  ;;  %v715_v39 = vsel %vm627_vm10, %v714_v34, %v710_v33  ;;  %v640_v41 = vrot.slane %v476_v11, %v639_v26 }
 0x1d8   :  { %v724_v43 = vrot.slane %v508_v14, %v639_v26 }
 0x1da   :  { %v474_v24 = vpop.xlane.xlu0 %473 }
 0x1db   :  { %v506_v27 = vpop.xlane.xlu1 %505  ;;  %v633_v31 = vrot.slane %v474_v24, %v632_v15 }
 0x1dc   :  { %v719_v19 = vrot.slane %v506_v27, %v632_v15 }
 0x1dd   :  { %v635_v40 = vsel %vm634_vm11, %v633_v31, %v628_v36 }
 0x1de   :  { %v478_v35 = vpop.xlane.xlu0 %477  ;;  %v720_v42 = vsel %vm634_vm11, %v719_v19, %v715_v39  ;;  %v642_v46 = vsel %vm641_vm12, %v640_v41, %v635_v40 }
 0x1df   :  { %v510_v37 = vpop.xlane.xlu1 %509  ;;  %v647_v48 = vrot.slane %v478_v35, %v646_v16  ;;  %v725_v50 = vsel %vm641_vm12, %v724_v43, %v720_v42 }
 0x1e0   :  { %v729_v49 = vrot.slane %v510_v37, %v646_v16 }
 0x1e1   :  { %v649_v51 = vsel %vm648_vm13, %v647_v48, %v642_v46 }
 0x1e2   :  { %v480_v44 = vpop.xlane.xlu0 %479  ;;  %v730_v6 = vsel %vm648_vm13, %v729_v49, %v725_v50 }
 0x1e3   :  { %v512_v45 = vpop.xlane.xlu1 %511  ;;  %v654_v47 = vrot.slane %v480_v44, %v653_v38 }
 0x1e4   :  { %v734_v52 = vrot.slane %v512_v45, %v653_v38 }
 0x1e5   :  { %v656_v53 = vsel %vm655_vm14, %v654_v47, %v649_v51 }
 0x1e6   :  { %v735_v54 = vsel %vm655_vm14, %v734_v52, %v730_v6 }
 0x1e7   :  { %v737_v55 = vsel %vm736_vm15, %v735_v54, %v656_v53 }
 0x1e8   :  { %v739_v56 = vsel %vm515_vm0, %v737_v55, -1e+30 }
 0x1e9   :  { %v741_v57 = vsel %vm740_vm1, %v739_v56, -inf }
 0x1ea   :  { %742 = vmax.xlane.f32.xlu0 %v741_v57 }
 0x273   :  { %v743_v58 = vpop.xlane.xlu0 %742 }
 0x274   :  { %v744_v59 = vsub.f32 %v739_v56, %v743_v58 }
 0x276   :  { %v745_v60 = vmul.f32 1.442695, %v744_v59 }
 0x278   :  { %1007 = vpow2.f32 %v745_v60 }
 0x285   :  { %v1008_v61 = vpop.eup %1007 }
 0x286   :  { %v747_v0 = vsel %vm740_vm1, %v1008_v61, 0.0 }
 0x287   :  { %748 = vadd.xlane.f32.xlu1 %v747_v0 }
 0x310   :  { %v749_v62 = vpop.xlane.xlu1 %748 }
 0x311   :  { %1009 = vrcp.f32 %v749_v62 }
 0x31e   :  { %v1010_v1 = vpop.eup %1009 }
 0x31f   :  { %v751_v2 = vmul.f32 %v1010_v1, %v749_v62 }
 0x321   :  { %v752_v5 = vsub.f32 2.0, %v751_v2 }
 0x323   :  { %v753_v3 = vmul.f32 %v1010_v1, %v752_v5 }
 0x325   :  { %v754_v63 = vmul.f32 %v1008_v61, %v753_v3 }
 0x327   :  { %755 = vst [vmem:[#allocation8] sm:$0x3] %v754_v63 }
 0x328   :  { %1082 = shalt.err (!%p1079_p5)
}
 0x329   :  { %765 = dma.vmem_to_hbm [thread:$0]  %s763_s7, 32, %s1298_s4, [#allocation4]  }
 0x32a   :  { %1095 = dma.done.wait [#allocation4], 32  }
 0x32b   :  { %1096 = vsyncadd [#allocation4], 4294967264 }
 0x32c   :  { %769 = vsyncpa [#allocation3], 1 }
 0x32d   :  { %770 = vsyncpa [#allocation6], 1 }
 0x32e   :  { %771 = vsyncpa [#allocation4], 1 }

</bundles_post_ra>
